<compile_context>
chip_gen: v6e
topology: v6e:2x2x1
jax: 0.10.0
libtpu: 0.0.40
codegen_flags: <defaults>
</compile_context>

<pallas_src>
import jax
import jax.numpy as jnp
from jax import lax
from jax.experimental import pallas as pl
from jax.experimental.pallas import tpu as pltpu


def _round_up(n: int, m: int) -> int:
    return ((n + m - 1) // m) * m


def _pick_tile(batch: int, num_hiddens: int, itemsize: int) -> int:
    """Pick the batch-tile size (rows of X per grid step)."""
    # Cap the double-buffered X tile at ~8 MiB so the whole footprint
    # (2 x X tile + W + bias + out + compiler scratch) fits the most
    # conservative scoped-VMEM default (16 MiB on v5e).
    x_budget_bytes = 8 * 1024 * 1024
    tb_vmem = max(8, (x_budget_bytes // (2 * num_hiddens * itemsize)) // 8 * 8)
    tb = min(1024, tb_vmem, _round_up(batch, 8))
    # Keep >= 2 grid steps when the batch allows it so the "parallel" batch axis
    # can shard across both TensorCores on v7x. Negligible cost elsewhere.
    if batch > 8 and pl.cdiv(batch, tb) < 2:
        tb = max(8, _round_up(pl.cdiv(batch, 2), 8))
    return tb


def _nsp_kernel(x_ref, w_ref, b_ref, o_ref):
    # x_ref: (TB, H)  VMEM  (batch tile, possibly a masked partial final block)
    # w_ref: (2, H)   VMEM  (native nn.Linear layout, lane-dense, resident)
    # b_ref: (1, 2)   VMEM  (bias row, resident)
    # o_ref: (TB, 2)  VMEM
    acc = lax.dot_general(
        x_ref[...], w_ref[...],
        dimension_numbers=(((1,), (1,)), ((), ())),   # contract over H
        preferred_element_type=jnp.float32,
    )
    o_ref[...] = (acc + b_ref[...]).astype(o_ref.dtype)


@jax.jit
def next_sentence_pred(x, weight, bias):
    """Forward of NextSentencePred.

    x:      (batch, num_hiddens)   f32 (or bf16 if the producer streams bf16)
    weight: (2, num_hiddens)       PyTorch nn.Linear layout, used as-is
    bias:   (2,)
    returns (batch, 2) in x.dtype
    """
    batch, num_hiddens = x.shape
    tb = _pick_tile(batch, num_hiddens, x.dtype.itemsize)
    grid = (pl.cdiv(batch, tb),)

    bias_row = jnp.reshape(bias, (1, 2))

    return pl.pallas_call(
        _nsp_kernel,
        out_shape=jax.ShapeDtypeStruct((batch, 2), x.dtype),
        grid=grid,
        in_specs=[
            # X: streamed batch tiles; final block masked by Pallas if batch % tb != 0.
            pl.BlockSpec((tb, num_hiddens), lambda i: (i, 0)),
            # W: single lane-dense block, resident across all grid steps.
            pl.BlockSpec((2, num_hiddens), lambda i: (0, 0)),
            # bias: tiny resident (1, 2) tile, broadcast-added in the kernel.
            pl.BlockSpec((1, 2), lambda i: (0, 0)),
        ],
        out_specs=pl.BlockSpec((tb, 2), lambda i: (i, 0)),
        compiler_params=pltpu.CompilerParams(
            dimension_semantics=("parallel",),   # megacore on v7x
        ),
    )(x, weight, bias_row)


if __name__ == "__main__":
    key = jax.random.PRNGKey(0)
    kx, kw, kb = jax.random.split(key, 3)

    batch = 8
    num_hiddens = 32

    # Deterministic synthetic inputs / parameters (no checkpoint).
    x = jax.random.normal(kx, (batch, num_hiddens), dtype=jnp.float32)
    weight = jax.random.normal(kw, (2, num_hiddens), dtype=jnp.float32) * 0.02
    bias = jax.random.normal(kb, (2,), dtype=jnp.float32) * 0.02

    y = next_sentence_pred(x, weight, bias)
    y = jax.block_until_ready(y)

    # Reference: same math as torch nn.Linear.
    y_ref = x @ weight.T + bias
    assert y.shape == (batch, 2)
    assert jnp.allclose(y, y_ref, atol=1e-5, rtol=1e-5)

    # Also exercise a non-tile-aligned, multi-step grid (partial final block path).
    batch2 = 20
    x2 = jax.random.normal(kx, (batch2, num_hiddens), dtype=jnp.float32)
    y2 = jax.block_until_ready(next_sentence_pred(x2, weight, bias))
    y2_ref = x2 @ weight.T + bias
    assert y2.shape == (batch2, 2)
    assert jnp.allclose(y2, y2_ref, atol=1e-5, rtol=1e-5)

    print("KERNEL_OK")
</pallas_src>

<mosaic_0001>
module attributes {stable_mosaic.version = 11 : i64} {
  func.func @_nsp_kernel(%arg0: i32, %arg1: memref<8x32xf32, #tpu.memory_space<vmem>>, %arg2: memref<2x32xf32, #tpu.memory_space<vmem>>, %arg3: memref<1x2xf32, #tpu.memory_space<vmem>>, %arg4: memref<8x2xf32, #tpu.memory_space<vmem>>) attributes {dimension_semantics = [#tpu.dimension_semantics<parallel>], iteration_bounds = array<i64: 1>, scalar_prefetch = 0 : i64, scratch_operands = 0 : i64, tpu.core_type = #tpu.core_type<tc>, window_params = [{transform_indices = @transform_0, window_bounds = array<i64: 8, 32>}, {pipeline_mode = #tpu.pipeline_mode<synchronous>, transform_indices = @transform_1, window_bounds = array<i64: 2, 32>}, {pipeline_mode = #tpu.pipeline_mode<synchronous>, transform_indices = @transform_2, window_bounds = array<i64: 1, 2>}, {transform_indices = @transform_3, window_bounds = array<i64: 8, 2>}]} {
    %c0 = arith.constant 0 : index
    %c0_0 = arith.constant 0 : index
    %0 = vector.load %arg1[%c0, %c0_0] : memref<8x32xf32, #tpu.memory_space<vmem>>, vector<8x32xf32>
    %c0_1 = arith.constant 0 : index
    %c0_2 = arith.constant 0 : index
    %1 = vector.load %arg2[%c0_1, %c0_2] : memref<2x32xf32, #tpu.memory_space<vmem>>, vector<2x32xf32>
    %cst = arith.constant dense<0.000000e+00> : vector<8x2xf32>
    %2 = tpu.matmul %0, %1, %cst {dimension_numbers = #tpu.dot_dimension_numbers<[1], [1], [0], [0], [0, 0, 1, 0], [], []>} : vector<8x32xf32>, vector<2x32xf32>, vector<8x2xf32> -> vector<8x2xf32>
    %c0_3 = arith.constant 0 : index
    %c0_4 = arith.constant 0 : index
    %3 = vector.load %arg3[%c0_3, %c0_4] : memref<1x2xf32, #tpu.memory_space<vmem>>, vector<1x2xf32>
    %4 = vector.broadcast %3 : vector<1x2xf32> to vector<8x2xf32>
    %5 = arith.addf %2, %4 : vector<8x2xf32>
    %c0_5 = arith.constant 0 : index
    %c0_6 = arith.constant 0 : index
    %6 = vector.load %arg4[%c0_5, %c0_6] : memref<8x2xf32, #tpu.memory_space<vmem>>, vector<8x2xf32>
    tpu.vector_store %arg4[%c0_5, %c0_6], %5 {strides = array<i32>} : memref<8x2xf32, #tpu.memory_space<vmem>>, vector<8x2xf32>,
    return
  }
  func.func @transform_0(%arg0: i32) -> (i32, i32) {
    %c0_i32 = arith.constant 0 : i32
    %c0_i32_0 = arith.constant 0 : i32
    return %arg0, %c0_i32 : i32, i32
  }
  func.func @transform_1(%arg0: i32) -> (i32, i32) {
    %c0_i32 = arith.constant 0 : i32
    %c0_i32_0 = arith.constant 0 : i32
    %c0_i32_1 = arith.constant 0 : i32
    return %c0_i32, %c0_i32_0 : i32, i32
  }
  func.func @transform_2(%arg0: i32) -> (i32, i32) {
    %c0_i32 = arith.constant 0 : i32
    %c0_i32_0 = arith.constant 0 : i32
    %c0_i32_1 = arith.constant 0 : i32
    return %c0_i32, %c0_i32_0 : i32, i32
  }
  func.func @transform_3(%arg0: i32) -> (i32, i32) {
    %c0_i32 = arith.constant 0 : i32
    %c0_i32_0 = arith.constant 0 : i32
    return %arg0, %c0_i32 : i32, i32
  }
}

</mosaic_0001>

<bundles_post_ra>
// kernel: next_sentence_pred.1
= control target key start
LH: loop header
LB: loop body
LE: loop exit
PB: predicated region body
PF: predicated region fallthrough
CT: control target
= control target key end

     0   :  { %8 = vsyncpa [#allocation3], 0  ;;  %s154_s12 = smov [#allocation2]   ;;  %s189_s0 = inlined_call_operand.hbm [shape: f32[8,32], index: 0, kind: input, shape index: {}]   ;;  %s190_s1 = inlined_call_operand.vmem [shape: f32[2,32], index: 1, kind: input, shape index: {}]   ;;  %s191_s2 = inlined_call_operand.vmem [shape: f32[1,2], index: 2, kind: input, shape index: {}]   ;;  %s192_s3 = inlined_call_operand.vmem [shape: f32[8,2], index: 3, kind: output, shape index: {}]  }
   0x1   :  { %s15_s13 = sshll.u32 %s154_s12, 4  ;;  %s16_s13 = int_to_ptr.vmem [resolvable:$true] %s15_s13 }
   0x2   :  { %s140_s14 = scalar_lea.vmem %s16_s13, 128  ;;  %p145_p1 = scmp.lt.s32.totalorder %s16_s13, %s16_s13 }
   0x3   :  { %p141_p0 = scmp.ne.s32.totalorder %s16_s13, %s140_s14  ;;  %p146_p2 = scmp.lt.s32.totalorder %s140_s14, %s140_s14 }
   0x5   :  { %p147_p3 = por %p146_p2, %p145_p1 }
   0x7   :  { %p148_p4 = pnand %p147_p3, %p141_p0 }
   0x9   :  { %151 = shalt.err (!%p148_p4)
}
   0xa   :  { %18 = dma.hbm_to_vmem [thread:$0]  %s189_s0, 128, %s16_s13, [#allocation3]  }
   0xb   :  { %152 = dma.done.wait [#allocation3], 128  }
   0xc   :  { %153 = vsyncadd [#allocation3], 4294967168  ;;  %v155_v0 = vmov 0.0   ;;  %vm156_vm0 = vmmov 0   ;;  %vm35_vm1 = vcmask 261120   ;;  %v26_v2 = vld [vmem:[#allocation2] sm:$0xff] }
   0xd   :  { %124 = vmatprep.subr.mxu0 %v155_v0  ;;  %126 = vmatprep.mubr.msk.f32.mxu0 %vm156_vm0, %v155_v0  ;;  %v27_v1 = vld [vmem:[%s190_s1] sm:$0x3]  ;;  %vm112_vm2 = vcmask 15360  }
   0xe   :  { %125 = vmatpush3.xpose.msk.msra.mxu0 %vm35_vm1, %v27_v1  ;;  %v119_v3 = vld [vmem:[%s191_s2] ss:$0 sm:$0xff] }
  0x11   :  { %127 = vmatmul.mubr.msk.f32.vlgmr.msra.gmra.mxu0 %vm35_vm1, %v26_v2 }
  0xd1   :  { %v108_v4 = vpop.f32.mrf.mxu0 }
  0xd2   :  { %v109_v5 = vadd.f32 %v119_v3, %v108_v4 }
  0xd3   :  { %v128_v6 = vpop.f32.mrf.mxu0 }
  0xd4   :  { %113 = vst.msk [vmem:[%s192_s3] sm:$0xff] %vm112_vm2, %v109_v5 }
  0xd5   :  { %118 = vsyncpa [#allocation3], 1 }

</bundles_post_ra>
